<compile_context>
chip_gen: v7x
topology: tpu7x:2x2x1
jax: 0.10.0
libtpu: 0.0.40
codegen_flags: <defaults>
</compile_context>

<pallas_src>
import jax
import jax.numpy as jnp
from jax import lax
from jax.experimental import pallas as pl
from jax.experimental.pallas import tpu as pltpu


def _forward_math(x, w1t, b1, w2t, b2, out_dtype):
    """Shared math: x [B,F], w1t [F,H], b1 [1,H], w2t [H,O], b2 [1,O]."""
    h = lax.dot_general(
        x, w1t,
        dimension_numbers=(((1,), (0,)), ((), ())),
        preferred_element_type=jnp.float32,
    ) + b1
    h = jnp.maximum(h, 0.0)

    logits = lax.dot_general(
        h, w2t,
        dimension_numbers=(((1,), (0,)), ((), ())),
        preferred_element_type=jnp.float32,
    ) + b2

    # softmax over axis 0 (the batch axis), matching F.softmax(x, 0).
    m = jnp.max(logits, axis=0, keepdims=True)
    e = jnp.exp(logits - m)
    denom = jnp.sum(e, axis=0, keepdims=True)
    # Exact divide: keeps column sums == 1 (needed for RL probabilities).
    return (e / denom).astype(out_dtype)


def net_kernel(x_ref, w1_ref, w2_ref, b_ref, o_ref):
    # x_ref : [B, F]   w1_ref: [F, H]   w2_ref: [H, O]
    # b_ref : [2, PAD] (row 0 = b1 padded, row 1 = b2 padded)   o_ref: [B, O]
    H = w1_ref.shape[1]
    O = w2_ref.shape[1]
    b1 = b_ref[0:1, :H]
    b2 = b_ref[1:2, :O]
    o_ref[...] = _forward_math(x_ref[...], w1_ref[...], b1, w2_ref[...], b2,
                               o_ref.dtype)


def net_steps_kernel(x_ref, w1_ref, w2_ref, b_ref, o_ref):
    # One grid step == one independent forward pass.
    # x_ref : [1, B, F]   o_ref : [1, B, O]   weights/biases as above (resident).
    H = w1_ref.shape[1]
    O = w2_ref.shape[1]
    b1 = b_ref[0:1, :H]
    b2 = b_ref[1:2, :O]
    o_ref[0] = _forward_math(x_ref[0], w1_ref[...], b1, w2_ref[...], b2,
                             o_ref.dtype)


def prepare_params(w1, b1, w2, b2):
    """One-time parameter layout prep, OUTSIDE the per-forward critical path.

    * Weights are transposed once to [in, out] so the kernel runs plain
      [M,K]x[K,N] MXU matmuls with zero per-call transpose work.
    * Both biases are packed into one lane-padded [2, PAD] f32 array so the
      kernel takes one fewer DMA'd operand per call.
    """
    H, F = w1.shape
    O, H2 = w2.shape
    assert H2 == H
    w1t = jnp.asarray(w1, jnp.float32).T          # [F, H]
    w2t = jnp.asarray(w2, jnp.float32).T          # [H, O]
    pad = ((max(H, O) + 127) // 128) * 128
    b_packed = jnp.zeros((2, pad), jnp.float32)
    b_packed = b_packed.at[0, :H].set(jnp.asarray(b1, jnp.float32))
    b_packed = b_packed.at[1, :O].set(jnp.asarray(b2, jnp.float32))
    return w1t, w2t, b_packed


@jax.jit
def net_forward(x, w1t, w2t, b_packed):
    """Single forward pass.  x: [B, F]; w1t: [F, H]; w2t: [H, O]."""
    B, F = x.shape
    H = w1t.shape[1]
    O = w2t.shape[1]

    cost = pl.CostEstimate(
        flops=2 * B * (F * H + H * O),
        transcendentals=B * O,  # exp() in the softmax
        bytes_accessed=4 * (B * F + F * H + H * O + b_packed.size + B * O),
    )

    vmem = pltpu.MemorySpace.VMEM
    return pl.pallas_call(
        net_kernel,
        out_shape=jax.ShapeDtypeStruct((B, O), jnp.float32),
        in_specs=[
            pl.BlockSpec((B, F), lambda: (0, 0), memory_space=vmem),
            pl.BlockSpec((F, H), lambda: (0, 0), memory_space=vmem),
            pl.BlockSpec((H, O), lambda: (0, 0), memory_space=vmem),
            pl.BlockSpec(b_packed.shape, lambda: (0, 0), memory_space=vmem),
        ],
        out_specs=pl.BlockSpec((B, O), lambda: (0, 0), memory_space=vmem),
        cost_estimate=cost,
    )(x, w1t, w2t, b_packed)


@jax.jit
def net_forward_steps(xs, w1t, w2t, b_packed):
    """Many independent forward passes in ONE pallas_call.

    xs: [N, B, F] -> [N, B, O].  Weights/biases stay VMEM-resident across the
    grid (their index_maps return the same block every step), so the launch
    and weight-DMA cost is paid once instead of N times.  The step axis is
    "parallel" so v7x's two TensorCores can split it; the axis-0 softmax is
    fully contained within each step's block.
    """
    N, B, F = xs.shape
    H = w1t.shape[1]
    O = w2t.shape[1]

    cost = pl.CostEstimate(
        flops=2 * N * B * (F * H + H * O),
        transcendentals=N * B * O,
        bytes_accessed=4 * (N * B * F + F * H + H * O + b_packed.size + N * B * O),
    )

    vmem = pltpu.MemorySpace.VMEM
    return pl.pallas_call(
        net_steps_kernel,
        out_shape=jax.ShapeDtypeStruct((N, B, O), jnp.float32),
        grid=(N,),
        in_specs=[
            pl.BlockSpec((1, B, F), lambda s: (s, 0, 0), memory_space=vmem),
            pl.BlockSpec((F, H), lambda s: (0, 0), memory_space=vmem),
            pl.BlockSpec((H, O), lambda s: (0, 0), memory_space=vmem),
            pl.BlockSpec(b_packed.shape, lambda s: (0, 0), memory_space=vmem),
        ],
        out_specs=pl.BlockSpec((1, B, O), lambda s: (s, 0, 0), memory_space=vmem),
        compiler_params=pltpu.CompilerParams(
            dimension_semantics=("parallel",)),
        cost_estimate=cost,
    )(xs, w1t, w2t, b_packed)


def reference_forward(x, w1, b1, w2, b2):
    h = jnp.maximum(x @ w1.T + b1, 0.0)
    logits = h @ w2.T + b2
    return jax.nn.softmax(logits, axis=0)


if __name__ == "__main__":
    # Small shapes consistent with Net(n_feature, n_hidden, n_output)
    B, n_feature, n_hidden, n_output = 8, 32, 64, 16
    N_steps = 4

    key = jax.random.PRNGKey(0)
    kx, kxs, kw1, kb1, kw2, kb2 = jax.random.split(key, 6)

    x = jax.random.normal(kx, (B, n_feature), dtype=jnp.float32)
    xs = jax.random.normal(kxs, (N_steps, B, n_feature), dtype=jnp.float32)

    # weight.data.normal_(0, 0.1) as in __init__; biases small deterministic uniform
    w1 = 0.1 * jax.random.normal(kw1, (n_hidden, n_feature), dtype=jnp.float32)
    b1 = 0.01 * jax.random.uniform(kb1, (n_hidden,), dtype=jnp.float32,
                                   minval=-1.0, maxval=1.0)
    w2 = 0.1 * jax.random.normal(kw2, (n_output, n_hidden), dtype=jnp.float32)
    b2 = 0.01 * jax.random.uniform(kb2, (n_output,), dtype=jnp.float32,
                                   minval=-1.0, maxval=1.0)

    # One-time parameter layout prep (NOT on the per-forward critical path).
    w1t, w2t, b_packed = prepare_params(w1, b1, w2, b2)

    # --- single forward ---
    out = net_forward(x, w1t, w2t, b_packed)
    out = jax.block_until_ready(out)
    ref = reference_forward(x, w1, b1, w2, b2)
    assert out.shape == (B, n_output)
    assert jnp.allclose(out, ref, atol=1e-5, rtol=1e-4), "mismatch vs. reference"
    # softmax over axis 0: each column sums to 1 (exact divide in kernel)
    assert jnp.allclose(jnp.sum(out, axis=0), jnp.ones((n_output,)), atol=1e-4)

    # --- grid-batched forward (weights resident across steps) ---
    outs = net_forward_steps(xs, w1t, w2t, b_packed)
    outs = jax.block_until_ready(outs)
    refs = jax.vmap(lambda xi: reference_forward(xi, w1, b1, w2, b2))(xs)
    assert outs.shape == (N_steps, B, n_output)
    assert jnp.allclose(outs, refs, atol=1e-5, rtol=1e-4), "steps mismatch vs. reference"
    assert jnp.allclose(jnp.sum(outs, axis=1),
                        jnp.ones((N_steps, n_output)), atol=1e-4)

    print("KERNEL_OK")
</pallas_src>

<mosaic_0001>
module attributes {stable_mosaic.version = 11 : i64} {
  func.func @net_kernel(%arg0: memref<8x32xf32, #tpu.memory_space<vmem>>, %arg1: memref<32x64xf32, #tpu.memory_space<vmem>>, %arg2: memref<64x16xf32, #tpu.memory_space<vmem>>, %arg3: memref<2x128xf32, #tpu.memory_space<vmem>>, %arg4: memref<8x16xf32, #tpu.memory_space<vmem>>) attributes {dimension_semantics = [], scalar_prefetch = 0 : i64, scratch_operands = 0 : i64, tpu.core_type = #tpu.core_type<tc>} {
    %c0 = arith.constant 0 : index
    %c0_0 = arith.constant 0 : index
    %0 = vector.load %arg3[%c0, %c0_0] : memref<2x128xf32, #tpu.memory_space<vmem>>, vector<1x64xf32>
    %c1 = arith.constant 1 : index
    %c0_1 = arith.constant 0 : index
    %1 = vector.load %arg3[%c1, %c0_1] : memref<2x128xf32, #tpu.memory_space<vmem>>, vector<1x16xf32>
    %c0_2 = arith.constant 0 : index
    %c0_3 = arith.constant 0 : index
    %2 = vector.load %arg0[%c0_2, %c0_3] : memref<8x32xf32, #tpu.memory_space<vmem>>, vector<8x32xf32>
    %c0_4 = arith.constant 0 : index
    %c0_5 = arith.constant 0 : index
    %3 = vector.load %arg1[%c0_4, %c0_5] : memref<32x64xf32, #tpu.memory_space<vmem>>, vector<32x64xf32>
    %c0_6 = arith.constant 0 : index
    %c0_7 = arith.constant 0 : index
    %4 = vector.load %arg2[%c0_6, %c0_7] : memref<64x16xf32, #tpu.memory_space<vmem>>, vector<64x16xf32>
    %cst = arith.constant dense<0.000000e+00> : vector<8x64xf32>
    %5 = tpu.matmul %2, %3, %cst {dimension_numbers = #tpu.dot_dimension_numbers<[1], [0], [0], [1], [0, 0, 1, 1], [], []>} : vector<8x32xf32>, vector<32x64xf32>, vector<8x64xf32> -> vector<8x64xf32>
    %6 = vector.broadcast %0 : vector<1x64xf32> to vector<8x64xf32>
    %7 = arith.addf %5, %6 : vector<8x64xf32>
    %cst_8 = arith.constant 0.000000e+00 : f32
    %8 = vector.broadcast %cst_8 : f32 to vector<8x64xf32>
    %9 = arith.maximumf %7, %8 : vector<8x64xf32>
    %cst_9 = arith.constant dense<0.000000e+00> : vector<8x16xf32>
    %10 = tpu.matmul %9, %4, %cst_9 {dimension_numbers = #tpu.dot_dimension_numbers<[1], [0], [0], [1], [0, 0, 1, 1], [], []>} : vector<8x64xf32>, vector<64x16xf32>, vector<8x16xf32> -> vector<8x16xf32>
    %11 = vector.broadcast %1 : vector<1x16xf32> to vector<8x16xf32>
    %12 = arith.addf %10, %11 : vector<8x16xf32>
    %cst_10 = arith.constant dense<0xFF800000> : vector<16xf32>
    %13 = vector.multi_reduction <maximumf>, %12, %cst_10 [0] : vector<8x16xf32> to vector<16xf32>
    %14 = vector.shape_cast %13 : vector<16xf32> to vector<1x16xf32>
    %15 = vector.broadcast %14 : vector<1x16xf32> to vector<8x16xf32>
    %16 = arith.subf %12, %15 : vector<8x16xf32>
    %17 = math.exp %16 : vector<8x16xf32>
    %cst_11 = arith.constant dense<0.000000e+00> : vector<16xf32>
    %18 = vector.multi_reduction <add>, %17, %cst_11 [0] : vector<8x16xf32> to vector<16xf32>
    %19 = vector.shape_cast %18 : vector<16xf32> to vector<1x16xf32>
    %20 = vector.broadcast %19 : vector<1x16xf32> to vector<8x16xf32>
    %21 = arith.divf %17, %20 : vector<8x16xf32>
    %c0_12 = arith.constant 0 : index
    %c0_13 = arith.constant 0 : index
    %22 = vector.load %arg4[%c0_12, %c0_13] : memref<8x16xf32, #tpu.memory_space<vmem>>, vector<8x16xf32>
    tpu.vector_store %arg4[%c0_12, %c0_13], %21 {strides = array<i32>} : memref<8x16xf32, #tpu.memory_space<vmem>>, vector<8x16xf32>,
    return
  }
}

</mosaic_0001>

<bundles_post_ra>
// kernel: net_forward.1
= control target key start
LH: loop header
LB: loop body
LE: loop exit
PB: predicated region body
PF: predicated region fallthrough
CT: control target
= control target key end

     0   :  { %v323_v3 = vmov 0.0|0.0   ;;  %vm324_vm0 = vmmov 0   ;;  %v325_v6 = vmov 0.0   ;;  %s412_s0 = inlined_call_operand.vmem [shape: f32[8,32], index: 0, kind: input, shape index: {}]   ;;  %s413_s1 = inlined_call_operand.vmem [shape: f32[32,64], index: 1, kind: input, shape index: {}]   ;;  %s414_s2 = inlined_call_operand.vmem [shape: f32[64,16], index: 2, kind: input, shape index: {}]   ;;  %s415_s3 = inlined_call_operand.vmem [shape: f32[2,128], index: 3, kind: input, shape index: {}]   ;;  %s416_s4 = inlined_call_operand.hbm [shape: f32[8,16], index: 4, kind: output, shape index: {}]  }
   0x1   :  { %v21_v0 = vld [vmem:[%s413_s1] sm:$0xff]  ;;  %v22_v1 = vld [vmem:[%s413_s1 + $0x8] sm:$0xff]  ;;  %v23_v2 = vld [vmem:[%s413_s1 + $0x10] sm:$0xff]  ;;  %273 = vmatprep.subr.bf16.mxu0 %v323_v3  ;;  %251 = vmatprep.mubr.msk.f32.mxu0 %vm324_vm0, %v325_v6 }
   0x2   :  { %v274_v4 = vpack.c.bf16 %v22_v1, %v21_v0  ;;  %v24_v5 = vld [vmem:[%s413_s1 + $0x18] sm:$0xff]  ;;  %v25_v7 = vld [vmem:[%s414_s2] sm:$0xff]  ;;  %279 = vmatprep.subr.bf16.mxu1 %v323_v3  ;;  %v26_v8 = vld [vmem:[%s414_s2 + $0x8] sm:$0xff]  ;;  %270 = vmatprep.mubr.msk.f32.mxu1 %vm324_vm0, %v325_v6 }
   0x3   :  { %v27_v9 = vld [vmem:[%s414_s2 + $0x10] sm:$0xff]  ;;  %v28_v10 = vld [vmem:[%s414_s2 + $0x18] sm:$0xff]  ;;  %v277_v11 = vpack.c.bf16 %v24_v5, %v23_v2  ;;  %v280_v12 = vpack.c.bf16 %v26_v8, %v25_v7 }
   0x4   :  { %275 = vmatpush3.bf16.msra.mxu0 %v274_v4 }
   0x5   :  { %276 = vmatprep.subr.bf16.mxu0 %v323_v3 }
   0x6   :  { %9 = vsyncpa [#allocation3], 0  ;;  %281 = vmatpush3.bf16.msra.mxu1 %v280_v12  ;;  %v283_v13 = vpack.c.bf16 %v28_v10, %v27_v9  ;;  %v29_v14 = vld [vmem:[%s414_s2 + $0x20] sm:$0xff]  ;;  %v30_v15 = vld [vmem:[%s414_s2 + $0x28] sm:$0xff]  ;;  %vm37_vm1 = vcmask 261120   ;;  %vm116_vm2 = vcmask 523264  }
   0x7   :  { %282 = vmatprep.subr.bf16.mxu1 %v323_v3  ;;  %v20_v16 = vld [vmem:[%s412_s0] sm:$0xff]  ;;  %v286_v17 = vpack.c.bf16 %v30_v15, %v29_v14  ;;  %v31_v18 = vld [vmem:[%s414_s2 + $0x30] sm:$0xff]  ;;  %v32_v19 = vld [vmem:[%s414_s2 + $0x38] sm:$0xff]  ;;  %vm190_vm3 = vcmask 130048   ;;  %s326_s2 = smov [#allocation2]  }
   0x8   :  { %278 = vmatpush3.bf16.msra.mxu0 %v277_v11  ;;  %v289_v20 = vpack.c.bf16 %v32_v19, %v31_v18  ;;  %v225_v21 = vld [vmem:[%s415_s3] ss:$0 sm:$0xff]  ;;  %v227_v26 = vld [vmem:[%s415_s3 + $0x1] ss:$0 sm:$0xff]  ;;  %s217_s3 = sshll.u32 %s326_s2, 4  ;;  %s218_s3 = int_to_ptr.vmem [resolvable:$true] %s217_s3 }
   0x9   :  { %s299_s17 = scalar_lea.vmem %s218_s3, 128  ;;  %p304_p1 = scmp.lt.s32.totalorder %s218_s3, %s218_s3 }
   0xa   :  { %284 = vmatpush3.bf16.msra.mxu1 %v283_v13  ;;  %p300_p0 = scmp.ne.s32.totalorder %s218_s3, %s299_s17  ;;  %p305_p2 = scmp.lt.s32.totalorder %s299_s17, %s299_s17 }
   0xb   :  { %252 = vmatmul.mubr.msk.f32.vlgmr.msra.gmra.mrb[0].mxu0 %vm37_vm1, %v20_v16  ;;  %285 = vmatprep.subr.bf16.mxu1 %v323_v3 }
   0xc   :  { %p306_p3 = por %p305_p2, %p304_p1 }
   0xe   :  { %287 = vmatpush3.bf16.msra.mxu1 %v286_v17  ;;  %p307_p4 = pnand %p306_p3, %p300_p0 }
   0xf   :  { %288 = vmatprep.subr.bf16.mxu1 %v323_v3 }
  0x12   :  { %290 = vmatpush3.bf16.msra.mxu1 %v289_v20 }
  0xde   :  { %v107_v22 = vpop.f32.mrb[0].mxu0 }
  0xdf   :  { %v108_v23 = vadd.f32 %v225_v21, %v107_v22  ;;  %v253_v24 = vpop.f32.mrb[1].mxu0 }
  0xe1   :  { %v111_v25 = vmax.f32 %v108_v23, 0.0 }
  0xe3   :  { %271 = vmatmul.mubr.msk.f32.vlgmr.msra.gmra.mrb[0].mxu1 %vm116_vm2, %v111_v25 }
 0x1b6   :  { %v186_v27 = vpop.f32.mrb[0].mxu1 }
 0x1b7   :  { %v187_v28 = vadd.f32 %v227_v26, %v186_v27  ;;  %v272_v29 = vpop.f32.mrb[1].mxu1 }
 0x1b9   :  { %v191_v30 = vsel %vm190_vm3, %v187_v28, -inf }
 0x1ba   :  { %v192_v31 = vrot.slane %v191_v30, 4 }
 0x1bc   :  { %v193_v32 = vmax.f32 %v191_v30, %v192_v31 }
 0x1be   :  { %v194_v33 = vrot.slane %v193_v32, 2 }
 0x1c0   :  { %v195_v34 = vmax.f32 %v193_v32, %v194_v33 }
 0x1c2   :  { %v196_v35 = vrot.slane %v195_v34, 1 }
 0x1c4   :  { %v197_v36 = vmax.f32 %v195_v34, %v196_v35 }
 0x1c6   :  { %v198_v37 = vsub.f32 %v187_v28, %v197_v36 }
 0x1c8   :  { %v199_v38 = vmul.f32 1.442695, %v198_v37 }
 0x1ca   :  { %295 = vpow2.f32 %v199_v38 }
 0x1d4   :  { %v296_v39 = vpop.eup %295 }
 0x1d5   :  { %v201_v40 = vsel %vm190_vm3, %v296_v39, 0.0 }
 0x1d6   :  { %v202_v41 = vrot.slane %v201_v40, 4 }
 0x1d8   :  { %v203_v42 = vadd.f32 %v202_v41, %v201_v40 }
 0x1da   :  { %v204_v43 = vrot.slane %v203_v42, 2 }
 0x1dc   :  { %v205_v44 = vadd.f32 %v204_v43, %v203_v42 }
 0x1de   :  { %v206_v45 = vrot.slane %v205_v44, 1 }
 0x1e0   :  { %v207_v46 = vadd.f32 %v206_v45, %v205_v44 }
 0x1e2   :  { %297 = vrcp.f32 %v207_v46 }
 0x1ec   :  { %v298_v47 = vpop.eup %297 }
 0x1ed   :  { %v209_v48 = vmul.f32 %v298_v47, %v296_v39 }
 0x1ef   :  { %210 = vst.msk [vmem:[#allocation2] sm:$0xff] %vm190_vm3, %v209_v48 }
 0x1f0   :  { %310 = shalt.err (!%p307_p4)
}
 0x1f1   :  { %s311_s20 = scalar_lea.hbm %s416_s4, 128 }
 0x1f2   :  { %p312_p5 = scmp.ne.s32.totalorder %s416_s4, %s311_s20  ;;  %p315_p6 = scmp.lt.u32.totalorder %s311_s20, %s416_s4 }
 0x1f4   :  { %p317_p7 = pnand %p315_p6, %p312_p5 }
 0x1f6   :  { %320 = shalt.err (!%p317_p7)
}
 0x1f7   :  { %220 = dma.vmem_to_hbm [thread:$0]  %s218_s3, 128, %s416_s4, [#allocation3]  }
 0x1f8   :  { %321 = dma.done.wait [#allocation3], 128  }
 0x1f9   :  { %322 = vsyncadd [#allocation3], 4294967168 }
 0x1fa   :  { %224 = vsyncpa [#allocation3], 1 }

</bundles_post_ra>
